<compile_context>
chip_gen: v7x
topology: tpu7x:2x2x1
jax: 0.10.0
libtpu: 0.0.40
codegen_flags: <defaults>
</compile_context>

<pallas_src>
import functools
import math

import jax
import jax.numpy as jnp
from jax.experimental import pallas as pl
from jax.experimental.pallas import tpu as pltpu


# v7x has 64 MiB physical VMEM (32 MiB default scoped); leave headroom.
VMEM_LIMIT_BYTES = 48 * 1024 * 1024


def _qkv_proj_kernel(x_ref, wq_ref, bq_ref, wk_ref, bk_ref, wv_ref, bv_ref,
                     q_ref, k_ref, v_ref, *, mxu_dtype):
    """One (batch, head) step: x (S,H) @ w_h (H,d) + b_h -> (S,d), head-major output."""
    x = x_ref[...].astype(mxu_dtype)            # bf16 MXU operand, f32 accumulate

    def proj(w_ref, b_ref):
        acc = jnp.dot(x, w_ref[...], preferred_element_type=jnp.float32)
        return acc + b_ref[...]                 # bias add in f32

    # 1/sqrt(head_dim) is folded into wq/bq at parameter-prep time.
    q_ref[...] = proj(wq_ref, bq_ref).astype(q_ref.dtype)
    k_ref[...] = proj(wk_ref, bk_ref).astype(k_ref.dtype)
    v_ref[...] = proj(wv_ref, bv_ref).astype(v_ref.dtype)


def _flash_attn_kernel(q_ref, k_ref, v_ref, ctx_ref, m_sc, l_sc, acc_sc,
                       *, mxu_dtype):
    """Online-softmax attention; kv blocks on the innermost 'arbitrary' grid axis."""
    ki = pl.program_id(3)

    @pl.when(ki == 0)
    def _():
        m_sc[...] = jnp.full_like(m_sc, -jnp.inf)
        l_sc[...] = jnp.zeros_like(l_sc)
        acc_sc[...] = jnp.zeros_like(acc_sc)

    q = q_ref[...]                               # (tq, d) bf16, already scaled
    k = k_ref[...]                               # (tk, d) bf16
    # Contract the trailing head_dim of both operands: no explicit K transpose.
    s = jax.lax.dot_general(q, k, (((1,), (1,)), ((), ())),
                            preferred_element_type=jnp.float32)   # (tq, tk) f32

    m_prev = m_sc[...]
    m_new = jnp.maximum(m_prev, jnp.max(s, axis=-1, keepdims=True))
    alpha = jnp.exp(m_prev - m_new)
    # TODO(synk): on v6e/v7x a bf16 exp (cast s - m_new) doubles EUP throughput; kept f32 for v5e.
    p = jnp.exp(s - m_new)
    l_sc[...] = alpha * l_sc[...] + jnp.sum(p, axis=-1, keepdims=True)
    acc_sc[...] = alpha * acc_sc[...] + jnp.dot(
        p.astype(mxu_dtype), v_ref[...], preferred_element_type=jnp.float32)
    m_sc[...] = m_new

    # TODO(synk): nn.Dropout on attention weights is identity in eval mode.

    @pl.when(ki == pl.num_programs(3) - 1)
    def _():
        inv = pl.reciprocal(l_sc[...], approx=True)   # EUP slot, not VALU divide
        ctx_ref[...] = (acc_sc[...] * inv).astype(ctx_ref.dtype)


def _out_proj_ln_kernel(ctx_ref, wo_ref, x_ref, bo_ref, gamma_ref, beta_ref,
                        out_ref, acc_ref, *, eps):
    """Accumulate ctx_h (S,d) @ wo_h (d,H) over heads, then +bias +residual +LayerNorm."""
    h = pl.program_id(1)

    @pl.when(h == 0)
    def _():
        acc_ref[...] = jnp.zeros_like(acc_ref)

    acc_ref[...] += jnp.dot(ctx_ref[...], wo_ref[...],
                            preferred_element_type=jnp.float32)

    @pl.when(h == pl.num_programs(1) - 1)
    def _():
        # TODO(synk): nn.Dropout on the projection output is identity in eval mode.
        y = acc_ref[...] + bo_ref[...] + x_ref[...]
        mean = jnp.mean(y, axis=-1, keepdims=True)
        var = jnp.mean(jnp.square(y - mean), axis=-1, keepdims=True)
        y_norm = (y - mean) * jax.lax.rsqrt(var + eps)
        out_ref[...] = (y_norm * gamma_ref[...] + beta_ref[...]).astype(out_ref.dtype)


def multi_head_self_attention(x, params, *, num_heads, eps=1e-5,
                              mxu_dtype=jnp.bfloat16, block_q=128, block_kv=128):
    B, S, H = x.shape
    assert H % num_heads == 0
    d = H // num_heads
    wq, bq, wk, bk, wv, bv, wo, bo, gamma, beta = params

    # ---- Parameter prep (trace/prep-time, not per-token work) ---------------
    # Head-major bf16 weights; 1/sqrt(d) folded into the Q projection.
    scale = 1.0 / math.sqrt(d)

    def head_major_in(w):                      # (H_in, H_out) -> (nh, H_in, d)
        return jnp.transpose(w.reshape(H, num_heads, d), (1, 0, 2)).astype(mxu_dtype)

    def head_major_bias(b, s=1.0):             # (1, H) -> (nh, 1, d), f32
        return (b.reshape(num_heads, 1, d) * s).astype(jnp.float32)

    wq_hm = head_major_in(wq * scale)
    wk_hm = head_major_in(wk)
    wv_hm = head_major_in(wv)
    wo_hm = wo.reshape(num_heads, d, H).astype(mxu_dtype)    # (nh, d, H)
    bq_hm = head_major_bias(bq, scale)
    bk_hm = head_major_bias(bk)
    bv_hm = head_major_bias(bv)
    bo2 = bo.reshape(1, H).astype(jnp.float32)
    gamma2 = gamma.reshape(1, H).astype(jnp.float32)
    beta2 = beta.reshape(1, H).astype(jnp.float32)

    block_q = min(block_q, S)
    block_kv = min(block_kv, S)
    assert S % block_q == 0 and S % block_kv == 0
    nq, nk = S // block_q, S // block_kv
    itemsize = jnp.dtype(mxu_dtype).itemsize

    # ---- Kernel 1: head-major QKV projection --------------------------------
    qkv_cost = pl.CostEstimate(
        flops=int(2 * B * S * H * H * 3),
        transcendentals=0,
        bytes_accessed=int(B * S * H * 4 + 3 * H * H * itemsize
                           + 3 * H * 4 + 3 * B * S * H * itemsize))
    w_in_spec = pl.BlockSpec((None, H, d), lambda b, h: (h, 0, 0))
    b_in_spec = pl.BlockSpec((None, 1, d), lambda b, h: (h, 0, 0))
    qkv_out_spec = pl.BlockSpec((None, None, S, d), lambda b, h: (b, h, 0, 0))

    q, k, v = pl.pallas_call(
        functools.partial(_qkv_proj_kernel, mxu_dtype=mxu_dtype),
        out_shape=tuple(jax.ShapeDtypeStruct((B, num_heads, S, d), mxu_dtype)
                        for _ in range(3)),
        grid_spec=pltpu.PrefetchScalarGridSpec(
            num_scalar_prefetch=0,
            grid=(B, num_heads),
            in_specs=[pl.BlockSpec((None, S, H), lambda b, h: (b, 0, 0)),   # x
                      w_in_spec, b_in_spec,                                  # Q
                      w_in_spec, b_in_spec,                                  # K
                      w_in_spec, b_in_spec],                                 # V
            out_specs=[qkv_out_spec, qkv_out_spec, qkv_out_spec],
        ),
        compiler_params=pltpu.CompilerParams(
            dimension_semantics=("parallel", "parallel"),
            vmem_limit_bytes=VMEM_LIMIT_BYTES),
        cost_estimate=qkv_cost,
    )(x, wq_hm, bq_hm, wk_hm, bk_hm, wv_hm, bv_hm)

    # ---- Kernel 2: flash-style attention -------------------------------------
    attn_cost = pl.CostEstimate(
        flops=int(4 * B * S * S * H),
        transcendentals=int(B * num_heads * S * S),
        bytes_accessed=int(4 * B * S * H * itemsize))
    q_spec = pl.BlockSpec((None, None, block_q, d), lambda b, h, qi, ki: (b, h, qi, 0))
    kv_spec = pl.BlockSpec((None, None, block_kv, d), lambda b, h, qi, ki: (b, h, ki, 0))

    ctx = pl.pallas_call(
        functools.partial(_flash_attn_kernel, mxu_dtype=mxu_dtype),
        out_shape=jax.ShapeDtypeStruct((B, num_heads, S, d), mxu_dtype),
        grid_spec=pltpu.PrefetchScalarGridSpec(
            num_scalar_prefetch=0,
            grid=(B, num_heads, nq, nk),
            in_specs=[q_spec, kv_spec, kv_spec],
            out_specs=pl.BlockSpec((None, None, block_q, d),
                                   lambda b, h, qi, ki: (b, h, qi, 0)),
            scratch_shapes=[pltpu.VMEM((block_q, 1), jnp.float32),    # running max
                            pltpu.VMEM((block_q, 1), jnp.float32),    # running sum
                            pltpu.VMEM((block_q, d), jnp.float32)],   # running acc
        ),
        compiler_params=pltpu.CompilerParams(
            dimension_semantics=("parallel", "parallel", "parallel", "arbitrary"),
            vmem_limit_bytes=VMEM_LIMIT_BYTES),
        cost_estimate=attn_cost,
    )(q, k, v)

    # ---- Kernel 3: out-projection + residual + LayerNorm ---------------------
    out_cost = pl.CostEstimate(
        flops=int(2 * B * S * H * H),
        transcendentals=0,
        bytes_accessed=int(B * S * H * itemsize + H * H * itemsize
                           + 2 * B * S * H * 4 + 3 * H * 4))
    vec_spec = pl.BlockSpec((1, H), lambda b, h: (0, 0))

    out = pl.pallas_call(
        functools.partial(_out_proj_ln_kernel, eps=eps),
        out_shape=jax.ShapeDtypeStruct((B, S, H), jnp.float32),
        grid_spec=pltpu.PrefetchScalarGridSpec(
            num_scalar_prefetch=0,
            grid=(B, num_heads),
            in_specs=[pl.BlockSpec((None, None, S, d), lambda b, h: (b, h, 0, 0)),  # ctx
                      pl.BlockSpec((None, d, H), lambda b, h: (h, 0, 0)),           # wo
                      pl.BlockSpec((None, S, H), lambda b, h: (b, 0, 0)),           # x (residual)
                      vec_spec, vec_spec, vec_spec],                                 # bo, gamma, beta
            out_specs=pl.BlockSpec((None, S, H), lambda b, h: (b, 0, 0)),
            scratch_shapes=[pltpu.VMEM((S, H), jnp.float32)],
        ),
        compiler_params=pltpu.CompilerParams(
            dimension_semantics=("parallel", "arbitrary"),
            vmem_limit_bytes=VMEM_LIMIT_BYTES),
        cost_estimate=out_cost,
    )(ctx, wo_hm, x, bo2, gamma2, beta2)

    return out


def reference_mhsa(x, params, *, num_heads, eps=1e-5):
    """Plain-JAX f32 reference mirroring the PyTorch forward (eval mode)."""
    wq, bq, wk, bk, wv, bv, wo, bo, gamma, beta = params
    B, S, H = x.shape
    d = H // num_heads

    def proj(w, b):
        return (x @ w + b).reshape(B, S, num_heads, d).transpose(0, 2, 1, 3)

    Q, K, V = proj(wq, bq), proj(wk, bk), proj(wv, bv)
    scores = jnp.einsum("bhqd,bhkd->bhqk", Q, K) / math.sqrt(d)
    attn = jax.nn.softmax(scores, axis=-1)
    ctx = jnp.einsum("bhqk,bhkd->bhqd", attn, V)
    ctx = ctx.transpose(0, 2, 1, 3).reshape(B, S, H)
    out = ctx @ wo + bo
    y = out + x
    mean = jnp.mean(y, axis=-1, keepdims=True)
    var = jnp.mean(jnp.square(y - mean), axis=-1, keepdims=True)
    return (y - mean) / jnp.sqrt(var + eps) * gamma + beta


if __name__ == "__main__":
    B, S, H = 2, 8, 32
    NUM_HEADS = 8

    key = jax.random.PRNGKey(0)
    keys = jax.random.split(key, 10)

    x = jax.random.normal(keys[0], (B, S, H), dtype=jnp.float32)

    # Deterministic parameter init (shapes from nn.Linear / nn.LayerNorm).
    # Weights stored as [H_in, H_out] (i.e. torch weight transposed).
    scale = 1.0 / math.sqrt(H)
    wq = jax.random.uniform(keys[1], (H, H), jnp.float32, -scale, scale)
    wk = jax.random.uniform(keys[2], (H, H), jnp.float32, -scale, scale)
    wv = jax.random.uniform(keys[3], (H, H), jnp.float32, -scale, scale)
    wo = jax.random.uniform(keys[4], (H, H), jnp.float32, -scale, scale)
    bq = jax.random.uniform(keys[5], (1, H), jnp.float32, -scale, scale)
    bk = jax.random.uniform(keys[6], (1, H), jnp.float32, -scale, scale)
    bv = jax.random.uniform(keys[7], (1, H), jnp.float32, -scale, scale)
    bo = jax.random.uniform(keys[8], (1, H), jnp.float32, -scale, scale)
    gamma = jnp.ones((1, H), jnp.float32)
    beta = jnp.zeros((1, H), jnp.float32)

    params = (wq, bq, wk, bk, wv, bv, wo, bo, gamma, beta)

    out = multi_head_self_attention(x, params, num_heads=NUM_HEADS)
    out = jax.block_until_ready(out)

    ref = reference_mhsa(x, params, num_heads=NUM_HEADS)
    assert out.shape == (B, S, H)
    # bf16 MXU operands (f32 accumulate) + approx-reciprocal softmax denominator:
    # tolerance re-derived for bf16 vs. the exact f32 reference.
    err = jnp.max(jnp.abs(out - ref))
    assert jnp.allclose(out, ref, atol=3e-2, rtol=3e-2), f"max abs err {err}"

    print("KERNEL_OK")
</pallas_src>

<mosaic_0001>
module attributes {stable_mosaic.version = 11 : i64} {
  func.func @_qkv_proj_kernel(%arg0: i32, %arg1: i32, %arg2: memref<1x8x32xf32, #tpu.memory_space<vmem>>, %arg3: memref<1x32x4xbf16, #tpu.memory_space<vmem>>, %arg4: memref<1x1x4xf32, #tpu.memory_space<vmem>>, %arg5: memref<1x32x4xbf16, #tpu.memory_space<vmem>>, %arg6: memref<1x1x4xf32, #tpu.memory_space<vmem>>, %arg7: memref<1x32x4xbf16, #tpu.memory_space<vmem>>, %arg8: memref<1x1x4xf32, #tpu.memory_space<vmem>>, %arg9: memref<1x1x8x4xbf16, #tpu.memory_space<vmem>>, %arg10: memref<1x1x8x4xbf16, #tpu.memory_space<vmem>>, %arg11: memref<1x1x8x4xbf16, #tpu.memory_space<vmem>>) attributes {dimension_semantics = [#tpu.dimension_semantics<parallel>, #tpu.dimension_semantics<parallel>], iteration_bounds = array<i64: 2, 8>, scalar_prefetch = 0 : i64, scratch_operands = 0 : i64, tpu.core_type = #tpu.core_type<tc>, window_params = [{transform_indices = @transform_0, window_bounds = array<i64: 1, 8, 32>}, {transform_indices = @transform_1, window_bounds = array<i64: 1, 32, 4>}, {transform_indices = @transform_2, window_bounds = array<i64: 1, 1, 4>}, {transform_indices = @transform_3, window_bounds = array<i64: 1, 32, 4>}, {transform_indices = @transform_4, window_bounds = array<i64: 1, 1, 4>}, {transform_indices = @transform_5, window_bounds = array<i64: 1, 32, 4>}, {transform_indices = @transform_6, window_bounds = array<i64: 1, 1, 4>}, {transform_indices = @transform_7, window_bounds = array<i64: 1, 1, 8, 4>}, {transform_indices = @transform_8, window_bounds = array<i64: 1, 1, 8, 4>}, {transform_indices = @transform_9, window_bounds = array<i64: 1, 1, 8, 4>}]} {
    %c0 = arith.constant 0 : index
    %c0_0 = arith.constant 0 : index
    %c0_1 = arith.constant 0 : index
    %0 = vector.load %arg2[%c0, %c0_0, %c0_1] : memref<1x8x32xf32, #tpu.memory_space<vmem>>, vector<1x8x32xf32>
    %1 = vector.shape_cast %0 : vector<1x8x32xf32> to vector<8x32xf32>
    %2 = arith.truncf %1 : vector<8x32xf32> to vector<8x32xbf16>
    %c0_2 = arith.constant 0 : index
    %c0_3 = arith.constant 0 : index
    %c0_4 = arith.constant 0 : index
    %3 = vector.load %arg3[%c0_2, %c0_3, %c0_4] : memref<1x32x4xbf16, #tpu.memory_space<vmem>>, vector<1x32x4xbf16>
    %4 = vector.shape_cast %3 : vector<1x32x4xbf16> to vector<32x4xbf16>
    %cst = arith.constant dense<0.000000e+00> : vector<8x4xf32>
    %5 = tpu.matmul %2, %4, %cst {dimension_numbers = #tpu.dot_dimension_numbers<[1], [0], [0], [1], [0, 0, 1, 1], [], []>} : vector<8x32xbf16>, vector<32x4xbf16>, vector<8x4xf32> -> vector<8x4xf32>
    %c0_5 = arith.constant 0 : index
    %c0_6 = arith.constant 0 : index
    %c0_7 = arith.constant 0 : index
    %6 = vector.load %arg4[%c0_5, %c0_6, %c0_7] : memref<1x1x4xf32, #tpu.memory_space<vmem>>, vector<1x1x4xf32>
    %7 = vector.shape_cast %6 : vector<1x1x4xf32> to vector<1x4xf32>
    %8 = vector.broadcast %7 : vector<1x4xf32> to vector<8x4xf32>
    %9 = arith.addf %5, %8 : vector<8x4xf32>
    %10 = arith.truncf %9 : vector<8x4xf32> to vector<8x4xbf16>
    %c0_8 = arith.constant 0 : index
    %c0_9 = arith.constant 0 : index
    %c0_10 = arith.constant 0 : index
    %c0_11 = arith.constant 0 : index
    %11 = vector.load %arg9[%c0_8, %c0_9, %c0_10, %c0_11] : memref<1x1x8x4xbf16, #tpu.memory_space<vmem>>, vector<1x1x8x4xbf16>
    %12 = vector.shape_cast %11 : vector<1x1x8x4xbf16> to vector<8x4xbf16>
    %13 = vector.shape_cast %10 : vector<8x4xbf16> to vector<1x1x8x4xbf16>
    tpu.vector_store %arg9[%c0_8, %c0_9, %c0_10, %c0_11], %13 {strides = array<i32>} : memref<1x1x8x4xbf16, #tpu.memory_space<vmem>>, vector<1x1x8x4xbf16>,
    %c0_12 = arith.constant 0 : index
    %c0_13 = arith.constant 0 : index
    %c0_14 = arith.constant 0 : index
    %14 = vector.load %arg5[%c0_12, %c0_13, %c0_14] : memref<1x32x4xbf16, #tpu.memory_space<vmem>>, vector<1x32x4xbf16>
    %15 = vector.shape_cast %14 : vector<1x32x4xbf16> to vector<32x4xbf16>
    %cst_15 = arith.constant dense<0.000000e+00> : vector<8x4xf32>
    %16 = tpu.matmul %2, %15, %cst_15 {dimension_numbers = #tpu.dot_dimension_numbers<[1], [0], [0], [1], [0, 0, 1, 1], [], []>} : vector<8x32xbf16>, vector<32x4xbf16>, vector<8x4xf32> -> vector<8x4xf32>
    %c0_16 = arith.constant 0 : index
    %c0_17 = arith.constant 0 : index
    %c0_18 = arith.constant 0 : index
    %17 = vector.load %arg6[%c0_16, %c0_17, %c0_18] : memref<1x1x4xf32, #tpu.memory_space<vmem>>, vector<1x1x4xf32>
    %18 = vector.shape_cast %17 : vector<1x1x4xf32> to vector<1x4xf32>
    %19 = vector.broadcast %18 : vector<1x4xf32> to vector<8x4xf32>
    %20 = arith.addf %16, %19 : vector<8x4xf32>
    %21 = arith.truncf %20 : vector<8x4xf32> to vector<8x4xbf16>
    %c0_19 = arith.constant 0 : index
    %c0_20 = arith.constant 0 : index
    %c0_21 = arith.constant 0 : index
    %c0_22 = arith.constant 0 : index
    %22 = vector.load %arg10[%c0_19, %c0_20, %c0_21, %c0_22] : memref<1x1x8x4xbf16, #tpu.memory_space<vmem>>, vector<1x1x8x4xbf16>
    %23 = vector.shape_cast %22 : vector<1x1x8x4xbf16> to vector<8x4xbf16>
    %24 = vector.shape_cast %21 : vector<8x4xbf16> to vector<1x1x8x4xbf16>
    tpu.vector_store %arg10[%c0_19, %c0_20, %c0_21, %c0_22], %24 {strides = array<i32>} : memref<1x1x8x4xbf16, #tpu.memory_space<vmem>>, vector<1x1x8x4xbf16>,
    %c0_23 = arith.constant 0 : index
    %c0_24 = arith.constant 0 : index
    %c0_25 = arith.constant 0 : index
    %25 = vector.load %arg7[%c0_23, %c0_24, %c0_25] : memref<1x32x4xbf16, #tpu.memory_space<vmem>>, vector<1x32x4xbf16>
    %26 = vector.shape_cast %25 : vector<1x32x4xbf16> to vector<32x4xbf16>
    %cst_26 = arith.constant dense<0.000000e+00> : vector<8x4xf32>
    %27 = tpu.matmul %2, %26, %cst_26 {dimension_numbers = #tpu.dot_dimension_numbers<[1], [0], [0], [1], [0, 0, 1, 1], [], []>} : vector<8x32xbf16>, vector<32x4xbf16>, vector<8x4xf32> -> vector<8x4xf32>
    %c0_27 = arith.constant 0 : index
    %c0_28 = arith.constant 0 : index
    %c0_29 = arith.constant 0 : index
    %28 = vector.load %arg8[%c0_27, %c0_28, %c0_29] : memref<1x1x4xf32, #tpu.memory_space<vmem>>, vector<1x1x4xf32>
    %29 = vector.shape_cast %28 : vector<1x1x4xf32> to vector<1x4xf32>
    %30 = vector.broadcast %29 : vector<1x4xf32> to vector<8x4xf32>
    %31 = arith.addf %27, %30 : vector<8x4xf32>
    %32 = arith.truncf %31 : vector<8x4xf32> to vector<8x4xbf16>
    %c0_30 = arith.constant 0 : index
    %c0_31 = arith.constant 0 : index
    %c0_32 = arith.constant 0 : index
    %c0_33 = arith.constant 0 : index
    %33 = vector.load %arg11[%c0_30, %c0_31, %c0_32, %c0_33] : memref<1x1x8x4xbf16, #tpu.memory_space<vmem>>, vector<1x1x8x4xbf16>
    %34 = vector.shape_cast %33 : vector<1x1x8x4xbf16> to vector<8x4xbf16>
    %35 = vector.shape_cast %32 : vector<8x4xbf16> to vector<1x1x8x4xbf16>
    tpu.vector_store %arg11[%c0_30, %c0_31, %c0_32, %c0_33], %35 {strides = array<i32>} : memref<1x1x8x4xbf16, #tpu.memory_space<vmem>>, vector<1x1x8x4xbf16>,
    return
  }
  func.func @transform_0(%arg0: i32, %arg1: i32) -> (i32, i32, i32) {
    %c0_i32 = arith.constant 0 : i32
    %c0_i32_0 = arith.constant 0 : i32
    %c0_i32_1 = arith.constant 0 : i32
    return %arg0, %c0_i32, %c0_i32_0 : i32, i32, i32
  }
  func.func @transform_1(%arg0: i32, %arg1: i32) -> (i32, i32, i32) {
    %c0_i32 = arith.constant 0 : i32
    %c0_i32_0 = arith.constant 0 : i32
    %c0_i32_1 = arith.constant 0 : i32
    return %arg1, %c0_i32, %c0_i32_0 : i32, i32, i32
  }
  func.func @transform_2(%arg0: i32, %arg1: i32) -> (i32, i32, i32) {
    %c0_i32 = arith.constant 0 : i32
    %c0_i32_0 = arith.constant 0 : i32
    %c0_i32_1 = arith.constant 0 : i32
    return %arg1, %c0_i32, %c0_i32_0 : i32, i32, i32
  }
  func.func @transform_3(%arg0: i32, %arg1: i32) -> (i32, i32, i32) {
    %c0_i32 = arith.constant 0 : i32
    %c0_i32_0 = arith.constant 0 : i32
    %c0_i32_1 = arith.constant 0 : i32
    return %arg1, %c0_i32, %c0_i32_0 : i32, i32, i32
  }
  func.func @transform_4(%arg0: i32, %arg1: i32) -> (i32, i32, i32) {
    %c0_i32 = arith.constant 0 : i32
    %c0_i32_0 = arith.constant 0 : i32
    %c0_i32_1 = arith.constant 0 : i32
    return %arg1, %c0_i32, %c0_i32_0 : i32, i32, i32
  }
  func.func @transform_5(%arg0: i32, %arg1: i32) -> (i32, i32, i32) {
    %c0_i32 = arith.constant 0 : i32
    %c0_i32_0 = arith.constant 0 : i32
    %c0_i32_1 = arith.constant 0 : i32
    return %arg1, %c0_i32, %c0_i32_0 : i32, i32, i32
  }
  func.func @transform_6(%arg0: i32, %arg1: i32) -> (i32, i32, i32) {
    %c0_i32 = arith.constant 0 : i32
    %c0_i32_0 = arith.constant 0 : i32
    %c0_i32_1 = arith.constant 0 : i32
    return %arg1, %c0_i32, %c0_i32_0 : i32, i32, i32
  }
  func.func @transform_7(%arg0: i32, %arg1: i32) -> (i32, i32, i32, i32) {
    %c0_i32 = arith.constant 0 : i32
    %c0_i32_0 = arith.constant 0 : i32
    %c0_i32_1 = arith.constant 0 : i32
    return %arg0, %arg1, %c0_i32, %c0_i32_0 : i32, i32, i32, i32
  }
  func.func @transform_8(%arg0: i32, %arg1: i32) -> (i32, i32, i32, i32) {
    %c0_i32 = arith.constant 0 : i32
    %c0_i32_0 = arith.constant 0 : i32
    %c0_i32_1 = arith.constant 0 : i32
    return %arg0, %arg1, %c0_i32, %c0_i32_0 : i32, i32, i32, i32
  }
  func.func @transform_9(%arg0: i32, %arg1: i32) -> (i32, i32, i32, i32) {
    %c0_i32 = arith.constant 0 : i32
    %c0_i32_0 = arith.constant 0 : i32
    %c0_i32_1 = arith.constant 0 : i32
    return %arg0, %arg1, %c0_i32, %c0_i32_0 : i32, i32, i32, i32
  }
}

</mosaic_0001>

<bundles_post_ra>
// kernel: tpu_custom_call.1
= control target key start
LH: loop header
LB: loop body
LE: loop exit
PB: predicated region body
PF: predicated region fallthrough
CT: control target
= control target key end

     0   :  { %s1141_s30 = smov 0   ;;  %s1143_s10 = smov 0   ;;  %s1232_s0 = inlined_call_operand.vmem [shape: f32[2,8,32], index: 0, kind: input, shape index: {}]   ;;  %s1233_s1 = inlined_call_operand.vmem [shape: bf16[8,32,4], index: 1, kind: input, shape index: {}]   ;;  %s1234_s2 = inlined_call_operand.vmem [shape: f32[8,1,4], index: 2, kind: input, shape index: {}]   ;;  %s1235_s3 = inlined_call_operand.vmem [shape: bf16[8,32,4], index: 3, kind: input, shape index: {}]   ;;  %s1236_s4 = inlined_call_operand.vmem [shape: f32[8,1,4], index: 4, kind: input, shape index: {}]   ;;  %s1237_s5 = inlined_call_operand.vmem [shape: bf16[8,32,4], index: 5, kind: input, shape index: {}]   ;;  %s1238_s6 = inlined_call_operand.vmem [shape: f32[8,1,4], index: 6, kind: input, shape index: {}]   ;;  %s1239_s7 = inlined_call_operand.vmem [shape: bf16[2,8,8,4], index: 7, kind: output, shape index: {0}]   ;;  %s1240_s8 = inlined_call_operand.vmem [shape: bf16[2,8,8,4], index: 8, kind: output, shape index: {1}]   ;;  %s1241_s9 = inlined_call_operand.vmem [shape: bf16[2,8,8,4], index: 9, kind: output, shape index: {2}]  }
   0x1   :  { %s1145_s11 = smov 0   ;;  %s1147_s12 = smov 0  }
   0x2   :  { %s1149_s13 = smov 0  }
   0x3 LB: > { %s29_s14 = sadd.s32 1, %s1079_s11  ;;  %s32_s15 = sadd.s32 1, %s1083_s12  ;;  %s1087_s13 = sphi %s1149_s13, %s20_s13   ;;  %s1083_s12 = sphi %s1147_s12, %s1245_s12   ;;  %s1079_s11 = sphi %s1145_s11, %s1244_s11   ;;  %s1075_s10 = sphi %s1143_s10, %s1243_s10   ;;  %s1071_s30 = sphi %s1141_s30, %s1242_s30  }
   0x4   : > { %p30_p0 = scmp.ge.s32.totalorder %s29_s14, 8  ;;  %p937_p1 = scmp.ge.s32.totalorder %s1087_s13, 1 }
   0x5   : > { %p363_p2 = scmp.lt.s32.totalorder %s1087_s13, 17 }
   0x6   : > { %s1247_s14 = smov (%p30_p0, %s29_s14), 0  ;;  %s1249_s15 = smov (!%p30_p0, %s32_s15), %s1083_s12 }
   0x7   : > { %p364_p3 = pnand %p937_p1, %p363_p2  ;;  %p34_p4 = scmp.ge.s32.totalorder %s1249_s15, 2 }
   0x8   : > { %p445_p5 = scmp.lt.s32.totalorder (!%p364_p3), %s1071_s30, 7  ;;  %p441_p6 = scmp.lt.s32.totalorder (!%p364_p3), %s1075_s10, 1  ;;  %v1089_v0 = vmov (!%p364_p3), 0.0   ;;  %vm1090_vm0 = vmmov (!%p364_p3), 0   ;;  %vm519_vm1 = vcmask (!%p364_p3), 261120   ;;  %vm564_vm2 = vcmask (!%p364_p3), 27648  }
   0x9   : > { %s1251_s15 = smov (%p34_p4, %s1249_s15), 0  ;;  %367 = sbr.rel (%p364_p3) target bundleno = 252 (0xfc), region = 48 }
   0xa   : > { %977 = vmatprep.subr.bf16.mxu0 (!%p364_p3), %v1089_v0  ;;  %985 = vmatprep.subr.bf16.mxu1 (!%p364_p3), %v1089_v0 }
   0xb   : > { %981 = vmatprep.mubr.msk.bf16.mxu0 (!%p364_p3), %vm1090_vm0, %v1089_v0  ;;  %989 = vmatprep.mubr.msk.bf16.mxu1 (!%p364_p3), %vm1090_vm0, %v1089_v0 }
  0x10   : > { %s1253_s30 = smov (!%p445_p5, %s1071_s30), 7  ;;  %s1255_s10 = smov (!%p441_p6, %s1075_s10), 1 }
  0x11   : > { %s965_s16 = sshll.u32 %s1253_s30, 4  ;;  %s938_s23 = sshll.u32 %s1255_s10, 3 }
  0x12   : > { %s449_s19 = scalar_lea.vmem %s1233_s1, %s965_s16  ;;  %s457_s22 = scalar_lea.vmem %s1235_s3, %s965_s16 }
  0x13   : > { %v1043_v1 = vld [vmem:[%s449_s19] sm:$0xff]   ;;  %v1044_v2 = vld [vmem:[%s449_s19 + $0x8] sm:$0xff]   ;;  %s444_s26 = scalar_lea.vmem %s1232_s0, %s938_s23  ;;  %s465_s29 = scalar_lea.vmem %s1237_s5, %s965_s16 }
  0x14   : > { %978 = vmatpush3.bf16.msra.mxu0 %v1043_v1  ;;  %v1045_v3 = vld [vmem:[%s457_s22] sm:$0xff]   ;;  %v1047_v6 = vld [vmem:[%s457_s22 + $0x8] sm:$0xff]   ;;  %s452_s17 = scalar_lea.vmem %s1234_s2, %s1253_s30  ;;  %s474_s18 = sadd.s32 %s938_s23, %s1253_s30 }
  0x15   : > { %979 = vmatprep.subr.bf16.mxu0 %v1089_v0  ;;  %v494_v4 = vld [vmem:[%s444_s26] sm:$0xff]  ;;  %986 = vmatpush3.bf16.msra.mxu1 %v1045_v3  ;;  %v1048_v8 = vld [vmem:[%s465_s29 + $0x8] sm:$0xff]   ;;  %s460_s21 = scalar_lea.vmem %s1236_s4, %s1253_s30  ;;  %s946_s22 = sshll.u32 %s474_s18, 2 }
  0x16   : > { %v495_v5 = vpack.c.bf16 %v494_v4, %v494_v4  ;;  %987 = vmatprep.subr.bf16.mxu1 %v1089_v0  ;;  %v1046_v7 = vld [vmem:[%s465_s29] sm:$0xff]   ;;  %s476_s26 = scalar_lea.vmem %s1239_s7, %s946_s22  ;;  %s468_s28 = scalar_lea.vmem %s1238_s6, %s1253_s30 }
  0x17   : > { %v951_v9 = vld [vmem:[%s452_s17] ss:$0 sm:$0xff]  ;;  %s484_s16 = scalar_lea.vmem %s1240_s8, %s946_s22  ;;  %s492_s19 = scalar_lea.vmem %s1241_s9, %s946_s22 }
  0x18   : > { %980 = vmatpush3.bf16.msra.mxu0 %v1044_v2  ;;  %v955_v11 = vld [vmem:[%s460_s21] ss:$0 sm:$0xff] }
  0x19   : > { %993 = vmatprep.subr.bf16.mxu0 %v1089_v0  ;;  %988 = vmatpush3.bf16.msra.mxu1 %v1047_v6  ;;  %v959_v23 = vld [vmem:[%s468_s28] ss:$0 sm:$0xff] }
  0x1b   : > { %982 = vmatmul.mubr.msk.bf16.vlgmr.msra.gmra.mrb[0].mxu0 %vm519_vm1, %v495_v5 }
  0x1c   : > { %994 = vmatpush3.bf16.msra.mxu0 %v1046_v7  ;;  %997 = vmatprep.mubr.msk.bf16.mxu0 %vm1090_vm0, %v1089_v0 }
  0x1d   : > { %995 = vmatprep.subr.bf16.mxu0 %v1089_v0  ;;  %990 = vmatmul.mubr.msk.bf16.vlgmr.msra.gmra.mrb[0].mxu1 %vm519_vm1, %v495_v5 }
  0x20   : > { %996 = vmatpush3.bf16.msra.mxu0 %v1048_v8 }
  0x23   : > { %998 = vmatmul.mubr.msk.bf16.vlgmr.msra.gmra.mrb[4].mxu0 %vm519_vm1, %v495_v5 }
  0xee   : > { %v557_v10 = vpop.f32.mrb[0].mxu0 }
  0xef   : > { %v558_v12 = vadd.f32 %v951_v9, %v557_v10  ;;  %v983_v13 = vpop.f32.mrb[1].mxu0 }
  0xf0   : > { %v560_v14 = vpop.f32.mrb[2].mxu0  ;;  %v623_v15 = vpop.f32.mrb[0].mxu1 }
  0xf1   : > { %v563_v16 = vpack.c.bf16 %v558_v12, %v558_v12  ;;  %v984_v17 = vpop.f32.mrb[3].mxu0  ;;  %v624_v18 = vadd.f32 %v955_v11, %v623_v15  ;;  %v991_v19 = vpop.f32.mrb[1].mxu1 }
  0xf2   : > { %v626_v20 = vpop.f32.mrb[2].mxu1 }
  0xf3   : > { %565 = vst.msk [vmem:[%s476_s26] sm:$0xf] %vm564_vm2, %v563_v16  ;;  %v629_v21 = vpack.c.bf16 %v624_v18, %v624_v18  ;;  %v992_v22 = vpop.f32.mrb[3].mxu1 }
  0xf5   : > { %630 = vst.msk [vmem:[%s484_s16] sm:$0xf] %vm564_vm2, %v629_v21 }
  0xf6   : > { %v688_v24 = vpop.f32.mrb[4].mxu0 }
  0xf7   : > { %v689_v25 = vadd.f32 %v959_v23, %v688_v24  ;;  %v999_v26 = vpop.f32.mrb[5].mxu0 }
  0xf8   : > { %v691_v27 = vpop.f32.mrb[6].mxu0 }
  0xf9   : > { %v694_v28 = vpack.c.bf16 %v689_v25, %v689_v25  ;;  %v1000_v29 = vpop.f32.mrb[7].mxu0 }
  0xfb   : > { %695 = vst.msk [vmem:[%s492_s19] sm:$0xf] %vm564_vm2, %v694_v28 }
  0xfc PF: > { %s20_s13 = sadd.s32 1, %s1087_s13   ;;  %s1242_s30 = smov %s1079_s11 }
  0xfd   : > { %p17_p7 = scmp.ge.s32.totalorder %s20_s13, 18   ;;  %s1243_s10 = smov %s1083_s12 }
  0xfe   : > { %s1244_s11 = smov %s1247_s14  ;;  %s1245_s12 = smov %s1251_s15 }
  0xff   :  { %19 = sbr.rel (!%p17_p7) target bundleno = 3 (0x3), region = 120 }

</bundles_post_ra>
